<compile_context>
chip_gen: v7x
topology: tpu7x:2x2x1
jax: 0.10.0
libtpu: 0.0.40
codegen_flags: <defaults>
</compile_context>

<pallas_src>
import jax
import jax.numpy as jnp
from jax.experimental import pallas as pl
from jax.experimental.pallas import tpu as pltpu

_EPS = 1e-5


# ------------------------------ fused Pallas forward ------------------------------ #

def bottleneck2d_pallas(x_nchw, params, downsample):
    stride = 2 if downsample else 1
    N, Cin, H, W = x_nchw.shape
    Cm = params["w1"].shape[0]
    Cout = params["w3"].shape[0]

    x = x_nchw.astype(jnp.float32)
    xs = x[:, :, ::stride, ::stride]              # 1x1 conv with stride == slicing
    Ho, Wo = xs.shape[2], xs.shape[3]
    Hp, Wp = Ho + 2, Wo + 2                       # zero-padded spatial dims (for the 3x3 conv)
    M = N * Ho * Wo                               # number of valid output pixels (BN divisor)
    Mp = N * Hp * Wp                              # padded-flat pixel axis (lane axis in-kernel)
    MARG = 128                                    # margin so all 9 shifted slices stay in bounds
    assert MARG >= Wp + 1
    EXT = Mp + 2 * MARG
    inv_m = 1.0 / float(M)

    # Padded-flat, channels-first layout: (C, N*Hp*Wp).  Stride-slice + zero-pad + transpose
    # fuse into one XLA copy feeding the kernel.
    xp = jnp.pad(xs, ((0, 0), (0, 0), (1, 1), (1, 1)))
    xp = jnp.transpose(xp, (1, 0, 2, 3)).reshape(Cin, Mp)

    # 1.0 at valid pixels, 0.0 at the zero-padding halo.
    mask = jnp.pad(jnp.ones((1, N, Ho, Wo), jnp.float32),
                   ((0, 0), (0, 0), (1, 1), (1, 1))).reshape(1, Mp)

    # Weights / BN params reshaped for the (C, M) layout.  Conv biases b1/b2/b3 intentionally
    # NOT passed: BN mean-subtraction cancels them exactly.
    w1k = params["w1"].reshape(Cm, Cin)
    w2k = jnp.transpose(params["w2"], (2, 3, 0, 1)).reshape(9, Cm, Cm)   # [ky*3+kx, out, in]
    w3k = params["w3"].reshape(Cout, Cm)
    g1, be1 = params["g1"].reshape(Cm, 1), params["be1"].reshape(Cm, 1)
    g2, be2 = params["g2"].reshape(Cm, 1), params["be2"].reshape(Cm, 1)
    g3, be3 = params["g3"].reshape(Cout, 1), params["be3"].reshape(Cout, 1)
    has_res = params.get("wr") is not None

    def kernel(xp_ref, mask_ref, w1_ref, g1_ref, b1_ref,
               w2_ref, g2_ref, b2_ref, w3_ref, g3_ref, b3_ref, *rest):
        if has_res:
            wr_ref, br_ref, o_ref, y1e_ref = rest
        else:
            o_ref, y1e_ref = rest

        mask_v = mask_ref[...]                    # (1, Mp)
        xp_v = xp_ref[...]                        # (Cin, Mp)

        def bn_relu(z, g_ref, b_ref, masked):
            # One-pass batch stats (biased variance) over the M valid pixels, f32 accumulation.
            zm = z * mask_v if masked else z      # masked=False only when z is exactly 0 at halo
            mean = jnp.sum(zm, axis=1, keepdims=True) * inv_m
            ex2 = jnp.sum(zm * z, axis=1, keepdims=True) * inv_m
            var = jnp.maximum(ex2 - mean * mean, 0.0)
            zn = (z - mean) * jax.lax.rsqrt(var + _EPS)
            return jnp.maximum(zn * g_ref[...] + b_ref[...], 0.0)

        # --- stage 1: 1x1 conv (stride folded into layout) + BN + ReLU ---
        z1 = jnp.dot(w1_ref[...], xp_v, preferred_element_type=jnp.float32)        # (Cm, Mp)
        y1 = bn_relu(z1, g1_ref, b1_ref, masked=False) * mask_v   # re-zero the padding halo

        # --- stage 2: 3x3 conv (pad=1) as 9 lane-shifted matmuls on the padded-flat layout ---
        y1e_ref[...] = jnp.zeros_like(y1e_ref)
        y1e_ref[:, pl.ds(MARG, Mp)] = y1
        z2 = jnp.zeros((Cm, Mp), jnp.float32)
        for ky in range(3):
            for kx in range(3):
                off = MARG + (ky - 1) * Wp + (kx - 1)
                z2 = z2 + jnp.dot(w2_ref[ky * 3 + kx], y1e_ref[:, pl.ds(off, Mp)],
                                  preferred_element_type=jnp.float32)
        y2 = bn_relu(z2, g2_ref, b2_ref, masked=True)

        # --- stage 3: 1x1 conv + BN + ReLU ---
        z3 = jnp.dot(w3_ref[...], y2, preferred_element_type=jnp.float32)          # (Cout, Mp)
        y3 = bn_relu(z3, g3_ref, b3_ref, masked=True)

        # --- residual (1x1 conv with bias, or identity) + final add (after last ReLU) ---
        if has_res:
            res = jnp.dot(wr_ref[...], xp_v, preferred_element_type=jnp.float32) + br_ref[...]
        else:
            res = xp_v            # identity residual (only shape-valid when stride==1, Cin==Cout)
        o_ref[...] = y3 + res     # halo columns hold garbage; wrapper slices them away

    inputs = [xp, mask, w1k, g1, be1, w2k, g2, be2, w3k, g3, be3]
    if has_res:
        inputs += [params["wr"].reshape(Cout, Cin), params["br"].reshape(Cout, 1)]

    out = pl.pallas_call(
        kernel,
        out_shape=jax.ShapeDtypeStruct((Cout, Mp), jnp.float32),
        in_specs=[pl.BlockSpec(memory_space=pltpu.MemorySpace.VMEM)] * len(inputs),
        out_specs=pl.BlockSpec(memory_space=pltpu.MemorySpace.VMEM),
        scratch_shapes=[pltpu.VMEM((Cm, EXT), jnp.float32)],
    )(*inputs)

    # (Cout, Mp) -> drop halo -> NCHW
    y = out.reshape(Cout, N, Hp, Wp)[:, :, 1:1 + Ho, 1:1 + Wo]
    return jnp.transpose(y, (1, 0, 2, 3))


# ------------------------------ pure-JAX reference ------------------------------ #

def bottleneck2d_ref(x, params, downsample):
    stride = 2 if downsample else 1
    dn = ("NCHW", "OIHW", "NCHW")

    def conv(x, w, b, s, pad):
        y = jax.lax.conv_general_dilated(x, w, (s, s), pad, dimension_numbers=dn)
        return y + b[None, :, None, None]

    def bn_relu(x, g, be):
        mean = jnp.mean(x, axis=(0, 2, 3), keepdims=True)
        var = jnp.mean((x - mean) ** 2, axis=(0, 2, 3), keepdims=True)
        xn = (x - mean) * jax.lax.rsqrt(var + _EPS)
        return jnp.maximum(xn * g[None, :, None, None] + be[None, :, None, None], 0.0)

    y = bn_relu(conv(x, params["w1"], params["b1"], stride, "VALID"), params["g1"], params["be1"])
    y = bn_relu(conv(y, params["w2"], params["b2"], 1, ((1, 1), (1, 1))), params["g2"], params["be2"])
    y = bn_relu(conv(y, params["w3"], params["b3"], 1, "VALID"), params["g3"], params["be3"])
    if params.get("wr") is not None:
        res = conv(x, params["wr"], params["br"], stride, "VALID")
    else:
        res = x
    return y + res


# ------------------------------ params / main ------------------------------ #

def init_params(key, Cin, Cm, Cout):
    ks = jax.random.split(key, 8)
    p = {
        "w1": 0.1 * jax.random.normal(ks[0], (Cm, Cin, 1, 1), jnp.float32),
        "b1": 0.1 * jax.random.normal(ks[1], (Cm,), jnp.float32),
        "g1": jnp.ones((Cm,), jnp.float32), "be1": jnp.zeros((Cm,), jnp.float32),
        "w2": 0.1 * jax.random.normal(ks[2], (Cm, Cm, 3, 3), jnp.float32),
        "b2": 0.1 * jax.random.normal(ks[3], (Cm,), jnp.float32),
        "g2": jnp.ones((Cm,), jnp.float32), "be2": jnp.zeros((Cm,), jnp.float32),
        "w3": 0.1 * jax.random.normal(ks[4], (Cout, Cm, 1, 1), jnp.float32),
        "b3": 0.1 * jax.random.normal(ks[5], (Cout,), jnp.float32),
        "g3": jnp.ones((Cout,), jnp.float32), "be3": jnp.zeros((Cout,), jnp.float32),
    }
    if Cin != Cout:
        p["wr"] = 0.1 * jax.random.normal(ks[6], (Cout, Cin, 1, 1), jnp.float32)
        p["br"] = 0.1 * jax.random.normal(ks[7], (Cout,), jnp.float32)
    else:
        p["wr"] = None
        p["br"] = None
    return p


if __name__ == "__main__":
    key = jax.random.PRNGKey(0)
    kx, kp = jax.random.split(key)

    # Bottlrneck2d(In_channel=4, Med_channel=8, Out_channel=16, downsample=True)
    N, Cin, H, W = 2, 4, 16, 16
    Cm, Cout = 8, 16
    downsample = True

    x = jax.random.normal(kx, (N, Cin, H, W), jnp.float32)
    params = init_params(kp, Cin, Cm, Cout)

    fwd = jax.jit(bottleneck2d_pallas, static_argnums=(2,))
    y = jax.block_until_ready(fwd(x, params, downsample))

    y_ref = bottleneck2d_ref(x, params, downsample)
    assert y.shape == y_ref.shape, (y.shape, y_ref.shape)
    err = float(jnp.max(jnp.abs(y - y_ref)))
    assert err < 2e-3, f"max abs err {err}"

    print("KERNEL_OK")
</pallas_src>

<mosaic_0001>
module attributes {stable_mosaic.version = 11 : i64} {
  func.func @kernel(%arg0: memref<4x200xf32, #tpu.memory_space<vmem>>, %arg1: memref<1x200xf32, #tpu.memory_space<vmem>>, %arg2: memref<8x4xf32, #tpu.memory_space<vmem>>, %arg3: memref<8x1xf32, #tpu.memory_space<vmem>>, %arg4: memref<8x1xf32, #tpu.memory_space<vmem>>, %arg5: memref<9x8x8xf32, #tpu.memory_space<vmem>>, %arg6: memref<8x1xf32, #tpu.memory_space<vmem>>, %arg7: memref<8x1xf32, #tpu.memory_space<vmem>>, %arg8: memref<16x8xf32, #tpu.memory_space<vmem>>, %arg9: memref<16x1xf32, #tpu.memory_space<vmem>>, %arg10: memref<16x1xf32, #tpu.memory_space<vmem>>, %arg11: memref<16x4xf32, #tpu.memory_space<vmem>>, %arg12: memref<16x1xf32, #tpu.memory_space<vmem>>, %arg13: memref<16x200xf32, #tpu.memory_space<vmem>>, %arg14: memref<8x456xf32, #tpu.memory_space<vmem>>) attributes {dimension_semantics = [], scalar_prefetch = 0 : i64, scratch_operands = 1 : i64, tpu.core_type = #tpu.core_type<tc>} {
    %c0 = arith.constant 0 : index
    %c0_0 = arith.constant 0 : index
    %0 = vector.load %arg1[%c0, %c0_0] : memref<1x200xf32, #tpu.memory_space<vmem>>, vector<1x200xf32>
    %c0_1 = arith.constant 0 : index
    %c0_2 = arith.constant 0 : index
    %1 = vector.load %arg0[%c0_1, %c0_2] : memref<4x200xf32, #tpu.memory_space<vmem>>, vector<4x200xf32>
    %c0_3 = arith.constant 0 : index
    %c0_4 = arith.constant 0 : index
    %2 = vector.load %arg2[%c0_3, %c0_4] : memref<8x4xf32, #tpu.memory_space<vmem>>, vector<8x4xf32>
    %cst = arith.constant dense<0.000000e+00> : vector<8x200xf32>
    %3 = tpu.matmul %2, %1, %cst {dimension_numbers = #tpu.dot_dimension_numbers<[1], [0], [0], [1], [0, 0, 1, 1], [], []>} : vector<8x4xf32>, vector<4x200xf32>, vector<8x200xf32> -> vector<8x200xf32>
    %cst_5 = arith.constant dense<0.000000e+00> : vector<8xf32>
    %4 = vector.multi_reduction <add>, %3, %cst_5 [1] : vector<8x200xf32> to vector<8xf32>
    %5 = vector.shape_cast %4 : vector<8xf32> to vector<8x1xf32>
    %cst_6 = arith.constant 7.812500e-03 : f32
    %6 = vector.broadcast %cst_6 : f32 to vector<8x1xf32>
    %7 = arith.mulf %5, %6 : vector<8x1xf32>
    %8 = arith.mulf %3, %3 : vector<8x200xf32>
    %cst_7 = arith.constant dense<0.000000e+00> : vector<8xf32>
    %9 = vector.multi_reduction <add>, %8, %cst_7 [1] : vector<8x200xf32> to vector<8xf32>
    %10 = vector.shape_cast %9 : vector<8xf32> to vector<8x1xf32>
    %cst_8 = arith.constant 7.812500e-03 : f32
    %11 = vector.broadcast %cst_8 : f32 to vector<8x1xf32>
    %12 = arith.mulf %10, %11 : vector<8x1xf32>
    %13 = arith.mulf %7, %7 : vector<8x1xf32>
    %14 = arith.subf %12, %13 : vector<8x1xf32>
    %cst_9 = arith.constant 0.000000e+00 : f32
    %15 = vector.broadcast %cst_9 : f32 to vector<8x1xf32>
    %16 = arith.maximumf %14, %15 : vector<8x1xf32>
    %17 = vector.broadcast %7 : vector<8x1xf32> to vector<8x200xf32>
    %18 = arith.subf %3, %17 : vector<8x200xf32>
    %cst_10 = arith.constant 9.99999974E-6 : f32
    %19 = vector.broadcast %cst_10 : f32 to vector<8x1xf32>
    %20 = arith.addf %16, %19 : vector<8x1xf32>
    %21 = math.rsqrt %20 : vector<8x1xf32>
    %22 = vector.broadcast %21 : vector<8x1xf32> to vector<8x200xf32>
    %23 = arith.mulf %18, %22 : vector<8x200xf32>
    %c0_11 = arith.constant 0 : index
    %c0_12 = arith.constant 0 : index
    %24 = vector.load %arg3[%c0_11, %c0_12] : memref<8x1xf32, #tpu.memory_space<vmem>>, vector<8x1xf32>
    %25 = vector.broadcast %24 : vector<8x1xf32> to vector<8x200xf32>
    %26 = arith.mulf %23, %25 : vector<8x200xf32>
    %c0_13 = arith.constant 0 : index
    %c0_14 = arith.constant 0 : index
    %27 = vector.load %arg4[%c0_13, %c0_14] : memref<8x1xf32, #tpu.memory_space<vmem>>, vector<8x1xf32>
    %28 = vector.broadcast %27 : vector<8x1xf32> to vector<8x200xf32>
    %29 = arith.addf %26, %28 : vector<8x200xf32>
    %cst_15 = arith.constant 0.000000e+00 : f32
    %30 = vector.broadcast %cst_15 : f32 to vector<8x200xf32>
    %31 = arith.maximumf %29, %30 : vector<8x200xf32>
    %32 = vector.broadcast %0 : vector<1x200xf32> to vector<8x200xf32>
    %33 = arith.mulf %31, %32 : vector<8x200xf32>
    %cst_16 = arith.constant 0.000000e+00 : f32
    %34 = vector.broadcast %cst_16 : f32 to vector<8x456xf32>
    %c0_17 = arith.constant 0 : index
    %c0_18 = arith.constant 0 : index
    %35 = vector.load %arg14[%c0_17, %c0_18] : memref<8x456xf32, #tpu.memory_space<vmem>>, vector<8x456xf32>
    tpu.vector_store %arg14[%c0_17, %c0_18], %34 {strides = array<i32>} : memref<8x456xf32, #tpu.memory_space<vmem>>, vector<8x456xf32>,
    %c0_19 = arith.constant 0 : index
    %c128 = arith.constant 128 : index
    %36 = vector.load %arg14[%c0_19, %c128] : memref<8x456xf32, #tpu.memory_space<vmem>>, vector<8x200xf32>
    tpu.vector_store %arg14[%c0_19, %c128], %33 {strides = array<i32>} : memref<8x456xf32, #tpu.memory_space<vmem>>, vector<8x200xf32>,
    %cst_20 = arith.constant 0.000000e+00 : f32
    %37 = vector.broadcast %cst_20 : f32 to vector<8x200xf32>
    %c0_21 = arith.constant 0 : index
    %c0_22 = arith.constant 0 : index
    %c0_23 = arith.constant 0 : index
    %38 = vector.load %arg5[%c0_21, %c0_22, %c0_23] : memref<9x8x8xf32, #tpu.memory_space<vmem>>, vector<1x8x8xf32>
    %39 = vector.shape_cast %38 : vector<1x8x8xf32> to vector<8x8xf32>
    %c0_24 = arith.constant 0 : index
    %c117 = arith.constant 117 : index
    %40 = vector.load %arg14[%c0_24, %c117] : memref<8x456xf32, #tpu.memory_space<vmem>>, vector<8x200xf32>
    %cst_25 = arith.constant dense<0.000000e+00> : vector<8x200xf32>
    %41 = tpu.matmul %39, %40, %cst_25 {dimension_numbers = #tpu.dot_dimension_numbers<[1], [0], [0], [1], [0, 0, 1, 1], [], []>} : vector<8x8xf32>, vector<8x200xf32>, vector<8x200xf32> -> vector<8x200xf32>
    %42 = arith.addf %37, %41 : vector<8x200xf32>
    %c1 = arith.constant 1 : index
    %c0_26 = arith.constant 0 : index
    %c0_27 = arith.constant 0 : index
    %43 = vector.load %arg5[%c1, %c0_26, %c0_27] : memref<9x8x8xf32, #tpu.memory_space<vmem>>, vector<1x8x8xf32>
    %44 = vector.shape_cast %43 : vector<1x8x8xf32> to vector<8x8xf32>
    %c0_28 = arith.constant 0 : index
    %c118 = arith.constant 118 : index
    %45 = vector.load %arg14[%c0_28, %c118] : memref<8x456xf32, #tpu.memory_space<vmem>>, vector<8x200xf32>
    %cst_29 = arith.constant dense<0.000000e+00> : vector<8x200xf32>
    %46 = tpu.matmul %44, %45, %cst_29 {dimension_numbers = #tpu.dot_dimension_numbers<[1], [0], [0], [1], [0, 0, 1, 1], [], []>} : vector<8x8xf32>, vector<8x200xf32>, vector<8x200xf32> -> vector<8x200xf32>
    %47 = arith.addf %42, %46 : vector<8x200xf32>
    %c2 = arith.constant 2 : index
    %c0_30 = arith.constant 0 : index
    %c0_31 = arith.constant 0 : index
    %48 = vector.load %arg5[%c2, %c0_30, %c0_31] : memref<9x8x8xf32, #tpu.memory_space<vmem>>, vector<1x8x8xf32>
    %49 = vector.shape_cast %48 : vector<1x8x8xf32> to vector<8x8xf32>
    %c0_32 = arith.constant 0 : index
    %c119 = arith.constant 119 : index
    %50 = vector.load %arg14[%c0_32, %c119] : memref<8x456xf32, #tpu.memory_space<vmem>>, vector<8x200xf32>
    %cst_33 = arith.constant dense<0.000000e+00> : vector<8x200xf32>
    %51 = tpu.matmul %49, %50, %cst_33 {dimension_numbers = #tpu.dot_dimension_numbers<[1], [0], [0], [1], [0, 0, 1, 1], [], []>} : vector<8x8xf32>, vector<8x200xf32>, vector<8x200xf32> -> vector<8x200xf32>
    %52 = arith.addf %47, %51 : vector<8x200xf32>
    %c3 = arith.constant 3 : index
    %c0_34 = arith.constant 0 : index
    %c0_35 = arith.constant 0 : index
    %53 = vector.load %arg5[%c3, %c0_34, %c0_35] : memref<9x8x8xf32, #tpu.memory_space<vmem>>, vector<1x8x8xf32>
    %54 = vector.shape_cast %53 : vector<1x8x8xf32> to vector<8x8xf32>
    %c0_36 = arith.constant 0 : index
    %c127 = arith.constant 127 : index
    %55 = vector.load %arg14[%c0_36, %c127] : memref<8x456xf32, #tpu.memory_space<vmem>>, vector<8x200xf32>
    %cst_37 = arith.constant dense<0.000000e+00> : vector<8x200xf32>
    %56 = tpu.matmul %54, %55, %cst_37 {dimension_numbers = #tpu.dot_dimension_numbers<[1], [0], [0], [1], [0, 0, 1, 1], [], []>} : vector<8x8xf32>, vector<8x200xf32>, vector<8x200xf32> -> vector<8x200xf32>
    %57 = arith.addf %52, %56 : vector<8x200xf32>
    %c4 = arith.constant 4 : index
    %c0_38 = arith.constant 0 : index
    %c0_39 = arith.constant 0 : index
    %58 = vector.load %arg5[%c4, %c0_38, %c0_39] : memref<9x8x8xf32, #tpu.memory_space<vmem>>, vector<1x8x8xf32>
    %59 = vector.shape_cast %58 : vector<1x8x8xf32> to vector<8x8xf32>
    %c0_40 = arith.constant 0 : index
    %c128_41 = arith.constant 128 : index
    %60 = vector.load %arg14[%c0_40, %c128_41] : memref<8x456xf32, #tpu.memory_space<vmem>>, vector<8x200xf32>
    %cst_42 = arith.constant dense<0.000000e+00> : vector<8x200xf32>
    %61 = tpu.matmul %59, %60, %cst_42 {dimension_numbers = #tpu.dot_dimension_numbers<[1], [0], [0], [1], [0, 0, 1, 1], [], []>} : vector<8x8xf32>, vector<8x200xf32>, vector<8x200xf32> -> vector<8x200xf32>
    %62 = arith.addf %57, %61 : vector<8x200xf32>
    %c5 = arith.constant 5 : index
    %c0_43 = arith.constant 0 : index
    %c0_44 = arith.constant 0 : index
    %63 = vector.load %arg5[%c5, %c0_43, %c0_44] : memref<9x8x8xf32, #tpu.memory_space<vmem>>, vector<1x8x8xf32>
    %64 = vector.shape_cast %63 : vector<1x8x8xf32> to vector<8x8xf32>
    %c0_45 = arith.constant 0 : index
    %c129 = arith.constant 129 : index
    %65 = vector.load %arg14[%c0_45, %c129] : memref<8x456xf32, #tpu.memory_space<vmem>>, vector<8x200xf32>
    %cst_46 = arith.constant dense<0.000000e+00> : vector<8x200xf32>
    %66 = tpu.matmul %64, %65, %cst_46 {dimension_numbers = #tpu.dot_dimension_numbers<[1], [0], [0], [1], [0, 0, 1, 1], [], []>} : vector<8x8xf32>, vector<8x200xf32>, vector<8x200xf32> -> vector<8x200xf32>
    %67 = arith.addf %62, %66 : vector<8x200xf32>
    %c6 = arith.constant 6 : index
    %c0_47 = arith.constant 0 : index
    %c0_48 = arith.constant 0 : index
    %68 = vector.load %arg5[%c6, %c0_47, %c0_48] : memref<9x8x8xf32, #tpu.memory_space<vmem>>, vector<1x8x8xf32>
    %69 = vector.shape_cast %68 : vector<1x8x8xf32> to vector<8x8xf32>
    %c0_49 = arith.constant 0 : index
    %c137 = arith.constant 137 : index
    %70 = vector.load %arg14[%c0_49, %c137] : memref<8x456xf32, #tpu.memory_space<vmem>>, vector<8x200xf32>
    %cst_50 = arith.constant dense<0.000000e+00> : vector<8x200xf32>
    %71 = tpu.matmul %69, %70, %cst_50 {dimension_numbers = #tpu.dot_dimension_numbers<[1], [0], [0], [1], [0, 0, 1, 1], [], []>} : vector<8x8xf32>, vector<8x200xf32>, vector<8x200xf32> -> vector<8x200xf32>
    %72 = arith.addf %67, %71 : vector<8x200xf32>
    %c7 = arith.constant 7 : index
    %c0_51 = arith.constant 0 : index
    %c0_52 = arith.constant 0 : index
    %73 = vector.load %arg5[%c7, %c0_51, %c0_52] : memref<9x8x8xf32, #tpu.memory_space<vmem>>, vector<1x8x8xf32>
    %74 = vector.shape_cast %73 : vector<1x8x8xf32> to vector<8x8xf32>
    %c0_53 = arith.constant 0 : index
    %c138 = arith.constant 138 : index
    %75 = vector.load %arg14[%c0_53, %c138] : memref<8x456xf32, #tpu.memory_space<vmem>>, vector<8x200xf32>
    %cst_54 = arith.constant dense<0.000000e+00> : vector<8x200xf32>
    %76 = tpu.matmul %74, %75, %cst_54 {dimension_numbers = #tpu.dot_dimension_numbers<[1], [0], [0], [1], [0, 0, 1, 1], [], []>} : vector<8x8xf32>, vector<8x200xf32>, vector<8x200xf32> -> vector<8x200xf32>
    %77 = arith.addf %72, %76 : vector<8x200xf32>
    %c8 = arith.constant 8 : index
    %c0_55 = arith.constant 0 : index
    %c0_56 = arith.constant 0 : index
    %78 = vector.load %arg5[%c8, %c0_55, %c0_56] : memref<9x8x8xf32, #tpu.memory_space<vmem>>, vector<1x8x8xf32>
    %79 = vector.shape_cast %78 : vector<1x8x8xf32> to vector<8x8xf32>
    %c0_57 = arith.constant 0 : index
    %c139 = arith.constant 139 : index
    %80 = vector.load %arg14[%c0_57, %c139] : memref<8x456xf32, #tpu.memory_space<vmem>>, vector<8x200xf32>
    %cst_58 = arith.constant dense<0.000000e+00> : vector<8x200xf32>
    %81 = tpu.matmul %79, %80, %cst_58 {dimension_numbers = #tpu.dot_dimension_numbers<[1], [0], [0], [1], [0, 0, 1, 1], [], []>} : vector<8x8xf32>, vector<8x200xf32>, vector<8x200xf32> -> vector<8x200xf32>
    %82 = arith.addf %77, %81 : vector<8x200xf32>
    %83 = vector.broadcast %0 : vector<1x200xf32> to vector<8x200xf32>
    %84 = arith.mulf %82, %83 : vector<8x200xf32>
    %cst_59 = arith.constant dense<0.000000e+00> : vector<8xf32>
    %85 = vector.multi_reduction <add>, %84, %cst_59 [1] : vector<8x200xf32> to vector<8xf32>
    %86 = vector.shape_cast %85 : vector<8xf32> to vector<8x1xf32>
    %cst_60 = arith.constant 7.812500e-03 : f32
    %87 = vector.broadcast %cst_60 : f32 to vector<8x1xf32>
    %88 = arith.mulf %86, %87 : vector<8x1xf32>
    %89 = arith.mulf %84, %82 : vector<8x200xf32>
    %cst_61 = arith.constant dense<0.000000e+00> : vector<8xf32>
    %90 = vector.multi_reduction <add>, %89, %cst_61 [1] : vector<8x200xf32> to vector<8xf32>
    %91 = vector.shape_cast %90 : vector<8xf32> to vector<8x1xf32>
    %cst_62 = arith.constant 7.812500e-03 : f32
    %92 = vector.broadcast %cst_62 : f32 to vector<8x1xf32>
    %93 = arith.mulf %91, %92 : vector<8x1xf32>
    %94 = arith.mulf %88, %88 : vector<8x1xf32>
    %95 = arith.subf %93, %94 : vector<8x1xf32>
    %cst_63 = arith.constant 0.000000e+00 : f32
    %96 = vector.broadcast %cst_63 : f32 to vector<8x1xf32>
    %97 = arith.maximumf %95, %96 : vector<8x1xf32>
    %98 = vector.broadcast %88 : vector<8x1xf32> to vector<8x200xf32>
    %99 = arith.subf %82, %98 : vector<8x200xf32>
    %cst_64 = arith.constant 9.99999974E-6 : f32
    %100 = vector.broadcast %cst_64 : f32 to vector<8x1xf32>
    %101 = arith.addf %97, %100 : vector<8x1xf32>
    %102 = math.rsqrt %101 : vector<8x1xf32>
    %103 = vector.broadcast %102 : vector<8x1xf32> to vector<8x200xf32>
    %104 = arith.mulf %99, %103 : vector<8x200xf32>
    %c0_65 = arith.constant 0 : index
    %c0_66 = arith.constant 0 : index
    %105 = vector.load %arg6[%c0_65, %c0_66] : memref<8x1xf32, #tpu.memory_space<vmem>>, vector<8x1xf32>
    %106 = vector.broadcast %105 : vector<8x1xf32> to vector<8x200xf32>
    %107 = arith.mulf %104, %106 : vector<8x200xf32>
    %c0_67 = arith.constant 0 : index
    %c0_68 = arith.constant 0 : index
    %108 = vector.load %arg7[%c0_67, %c0_68] : memref<8x1xf32, #tpu.memory_space<vmem>>, vector<8x1xf32>
    %109 = vector.broadcast %108 : vector<8x1xf32> to vector<8x200xf32>
    %110 = arith.addf %107, %109 : vector<8x200xf32>
    %cst_69 = arith.constant 0.000000e+00 : f32
    %111 = vector.broadcast %cst_69 : f32 to vector<8x200xf32>
    %112 = arith.maximumf %110, %111 : vector<8x200xf32>
    %c0_70 = arith.constant 0 : index
    %c0_71 = arith.constant 0 : index
    %113 = vector.load %arg8[%c0_70, %c0_71] : memref<16x8xf32, #tpu.memory_space<vmem>>, vector<16x8xf32>
    %cst_72 = arith.constant dense<0.000000e+00> : vector<16x200xf32>
    %114 = tpu.matmul %113, %112, %cst_72 {dimension_numbers = #tpu.dot_dimension_numbers<[1], [0], [0], [1], [0, 0, 1, 1], [], []>} : vector<16x8xf32>, vector<8x200xf32>, vector<16x200xf32> -> vector<16x200xf32>
    %115 = vector.broadcast %0 : vector<1x200xf32> to vector<16x200xf32>
    %116 = arith.mulf %114, %115 : vector<16x200xf32>
    %cst_73 = arith.constant dense<0.000000e+00> : vector<16xf32>
    %117 = vector.multi_reduction <add>, %116, %cst_73 [1] : vector<16x200xf32> to vector<16xf32>
    %118 = vector.shape_cast %117 : vector<16xf32> to vector<16x1xf32>
    %cst_74 = arith.constant 7.812500e-03 : f32
    %119 = vector.broadcast %cst_74 : f32 to vector<16x1xf32>
    %120 = arith.mulf %118, %119 : vector<16x1xf32>
    %121 = arith.mulf %116, %114 : vector<16x200xf32>
    %cst_75 = arith.constant dense<0.000000e+00> : vector<16xf32>
    %122 = vector.multi_reduction <add>, %121, %cst_75 [1] : vector<16x200xf32> to vector<16xf32>
    %123 = vector.shape_cast %122 : vector<16xf32> to vector<16x1xf32>
    %cst_76 = arith.constant 7.812500e-03 : f32
    %124 = vector.broadcast %cst_76 : f32 to vector<16x1xf32>
    %125 = arith.mulf %123, %124 : vector<16x1xf32>
    %126 = arith.mulf %120, %120 : vector<16x1xf32>
    %127 = arith.subf %125, %126 : vector<16x1xf32>
    %cst_77 = arith.constant 0.000000e+00 : f32
    %128 = vector.broadcast %cst_77 : f32 to vector<16x1xf32>
    %129 = arith.maximumf %127, %128 : vector<16x1xf32>
    %130 = vector.broadcast %120 : vector<16x1xf32> to vector<16x200xf32>
    %131 = arith.subf %114, %130 : vector<16x200xf32>
    %cst_78 = arith.constant 9.99999974E-6 : f32
    %132 = vector.broadcast %cst_78 : f32 to vector<16x1xf32>
    %133 = arith.addf %129, %132 : vector<16x1xf32>
    %134 = math.rsqrt %133 : vector<16x1xf32>
    %135 = vector.broadcast %134 : vector<16x1xf32> to vector<16x200xf32>
    %136 = arith.mulf %131, %135 : vector<16x200xf32>
    %c0_79 = arith.constant 0 : index
    %c0_80 = arith.constant 0 : index
    %137 = vector.load %arg9[%c0_79, %c0_80] : memref<16x1xf32, #tpu.memory_space<vmem>>, vector<16x1xf32>
    %138 = vector.broadcast %137 : vector<16x1xf32> to vector<16x200xf32>
    %139 = arith.mulf %136, %138 : vector<16x200xf32>
    %c0_81 = arith.constant 0 : index
    %c0_82 = arith.constant 0 : index
    %140 = vector.load %arg10[%c0_81, %c0_82] : memref<16x1xf32, #tpu.memory_space<vmem>>, vector<16x1xf32>
    %141 = vector.broadcast %140 : vector<16x1xf32> to vector<16x200xf32>
    %142 = arith.addf %139, %141 : vector<16x200xf32>
    %cst_83 = arith.constant 0.000000e+00 : f32
    %143 = vector.broadcast %cst_83 : f32 to vector<16x200xf32>
    %144 = arith.maximumf %142, %143 : vector<16x200xf32>
    %c0_84 = arith.constant 0 : index
    %c0_85 = arith.constant 0 : index
    %145 = vector.load %arg11[%c0_84, %c0_85] : memref<16x4xf32, #tpu.memory_space<vmem>>, vector<16x4xf32>
    %cst_86 = arith.constant dense<0.000000e+00> : vector<16x200xf32>
    %146 = tpu.matmul %145, %1, %cst_86 {dimension_numbers = #tpu.dot_dimension_numbers<[1], [0], [0], [1], [0, 0, 1, 1], [], []>} : vector<16x4xf32>, vector<4x200xf32>, vector<16x200xf32> -> vector<16x200xf32>
    %c0_87 = arith.constant 0 : index
    %c0_88 = arith.constant 0 : index
    %147 = vector.load %arg12[%c0_87, %c0_88] : memref<16x1xf32, #tpu.memory_space<vmem>>, vector<16x1xf32>
    %148 = vector.broadcast %147 : vector<16x1xf32> to vector<16x200xf32>
    %149 = arith.addf %146, %148 : vector<16x200xf32>
    %150 = arith.addf %144, %149 : vector<16x200xf32>
    %c0_89 = arith.constant 0 : index
    %c0_90 = arith.constant 0 : index
    %151 = vector.load %arg13[%c0_89, %c0_90] : memref<16x200xf32, #tpu.memory_space<vmem>>, vector<16x200xf32>
    tpu.vector_store %arg13[%c0_89, %c0_90], %150 {strides = array<i32>} : memref<16x200xf32, #tpu.memory_space<vmem>>, vector<16x200xf32>,
    return
  }
}

</mosaic_0001>

<bundles_post_ra>
// kernel: bottleneck2d_pallas.1
= control target key start
LH: loop header
LB: loop body
LE: loop exit
PB: predicated region body
PF: predicated region fallthrough
CT: control target
= control target key end

     0   :  { %vm53_vm0 = vcmask 1043456   ;;  %v1348_v1 = vmov 0.0   ;;  %vm49_vm1 = vcmask 31744   ;;  %vm129_vm2 = vcmask 588800   ;;  %s1352_s15 = smov 1   ;;  %s1353_s16 = smov 11   ;;  %s1601_s0 = inlined_call_operand.vmem [shape: f32[4,200], index: 0, kind: input, shape index: {}]   ;;  %s1602_s2 = inlined_call_operand.vmem [shape: f32[8,4], index: 2, kind: input, shape index: {}]   ;;  %s1603_s3 = inlined_call_operand.vmem [shape: f32[8,1], index: 3, kind: input, shape index: {}]   ;;  %s1604_s4 = inlined_call_operand.vmem [shape: f32[8,1], index: 4, kind: input, shape index: {}]   ;;  %s1605_s1 = inlined_call_operand.vmem [shape: f32[1,200], index: 1, kind: input, shape index: {}]   ;;  %s1606_s5 = inlined_call_operand.vmem [shape: f32[9,8,8], index: 5, kind: input, shape index: {}]   ;;  %s1607_s7 = inlined_call_operand.vmem [shape: f32[8,1], index: 7, kind: input, shape index: {}]   ;;  %s1608_s9 = inlined_call_operand.vmem [shape: f32[16,1], index: 9, kind: input, shape index: {}]   ;;  %s1609_s6 = inlined_call_operand.vmem [shape: f32[8,1], index: 6, kind: input, shape index: {}]   ;;  %s1610_s8 = inlined_call_operand.vmem [shape: f32[16,8], index: 8, kind: input, shape index: {}]   ;;  %s1611_s11 = inlined_call_operand.vmem [shape: f32[16,4], index: 11, kind: input, shape index: {}]   ;;  %s1612_s10 = inlined_call_operand.vmem [shape: f32[16,1], index: 10, kind: input, shape index: {}]   ;;  %s1613_s12 = inlined_call_operand.vmem [shape: f32[16,1], index: 12, kind: input, shape index: {}]   ;;  %s1614_s13 = inlined_call_operand.vmem [shape: f32[16,200], index: 13, kind: output, shape index: {}]  }
   0x1   :  { %v1431_v0 = vld [vmem:[%s1601_s0] sm:$0xff]  ;;  %122 = vmatprep.mubr.f32.mxu0 %v1348_v1  ;;  %184 = vst [vmem:[#allocation2 + $0x10] sm:$0xff] %v1348_v1  ;;  %448 = vmatprep.mubr.f32.mxu1 %v1348_v1  ;;  %v1349_v4 = vmov 0   ;;  %v170_v23 = vlaneseq  ;;  %s1354_s17 = smov 119   ;;  %s1355_s18 = smov 10   ;;  %vm376_vm3 = vcmask 72704  }
   0x2   :  { %v1438_v2 = vcombine.high %v1431_v0, %v1431_v0  ;;  %v46_v3 = vld [vmem:[%s1602_s2] sm:$0xff]  ;;  %1337 = vset.pattern.permute.xlu1 %v1349_v4  ;;  %1338 = vset.pattern.permute.xlu0 %v1349_v4  ;;  %s1356_s19 = smov 118   ;;  %s1357_s20 = smov 117   ;;  %vm208_vm4 = vcmask 64512   ;;  %v1291_v50 = vld [vmem:[%s1606_s5 + $0x10] sm:$0xff]  ;;  %vm465_vm5 = vcmask 7168  }
   0x3   :  { %v151_v5 = vld [vmem:[%s1603_s3] sm:$0xff]  ;;  %s1350_s3 = smov 9   ;;  %v171_v24 = vshrl.u32 %v170_v23, 7  ;;  %v1293_v58 = vld [vmem:[%s1606_s5 + $0x18] sm:$0xff]  ;;  %vm630_vm6 = vcmask 1039360   ;;  %vm203_vm7 = vcmask 80896  }
   0x4   :  { %1285 = vmatprep.subr.msk.mxu0 %vm53_vm0, %v1438_v2  ;;  %154 = vperm.xlu1 %1337, %v151_v5   ;;  %v159_v6 = vld [vmem:[%s1604_s4] sm:$0xff]  ;;  %vm716_vm8 = vcmask 973824   ;;  %vm289_vm9 = vcmask 89088   ;;  %vm802_vm10 = vcmask 965632   ;;  %vm888_vm11 = vcmask 957440   ;;  %v1301_v23 = vld [vmem:[%s1606_s5 + $0x38] sm:$0xff] }
   0x5   :  { %1286 = vmatpush1.msk.msra.mxu0 %vm53_vm0, %v1431_v0  ;;  %v172_v31 = vsub.s32 0, %v171_v24  ;;  %v176_v32 = vsub.s32 1, %v171_v24  ;;  %v44_v33 = vld [vmem:[%s1605_s1] sm:$0x3]  ;;  %s1351_s1 = smov 127  }
   0x6   :  { %1287 = vmatmul.mubr.msk.f32.vlgmr.msra.gmra.mrb[0].mxu0 %vm49_vm1, %v46_v3  ;;  %v1295_v63 = vld [vmem:[%s1606_s5 + $0x20] sm:$0xff] }
   0x7   :  { %276 = vmatprep.mubr.f32.mxu0 %v1348_v1  ;;  %v1462_v39 = vrot.slane %v44_v33, %v172_v31  ;;  %v1464_v40 = vrot.slane %v44_v33, %v176_v32 }
   0x8   :  { %162 = vperm.xlu1 %1337, %v159_v6  }
   0xc   :  { %370 = vrot.lane.b32.xlu1 %v1348_v1, %s1350_s3 }
  0x83   :  { %v155_v25 = vpop.permute.xlu1 %154 }
  0x87   :  { %v163_v36 = vpop.permute.xlu1 %162 }
  0x8b   :  { %v371_v46 = vpop.permute.xlu1 %370 }
  0xd9   :  { %v124_v7 = vpop.f32.mrb[0].mxu0 }
  0xda   :  { %v126_v8 = vpop.f32.mrb[1].mxu0  ;;  %v135_v12 = vmul.f32 %v124_v7, %v124_v7 }
  0xdb   :  { %v136_v9 = vmul.f32 %v126_v8, %v126_v8  ;;  %v130_v10 = vsel %vm129_vm2, %v126_v8, 0.0 }
  0xdc   :  { %v131_v11 = vadd.f32 %v130_v10, %v124_v7 }
  0xdd   :  { %v137_v13 = vsel %vm129_vm2, %v136_v9, 0.0 }
  0xde   :  { %132 = vadd.xlane.f32.xlu0 %v131_v11  ;;  %v138_v14 = vadd.f32 %v137_v13, %v135_v12  ;;  %v1288_v11 = vld [vmem:[%s1606_s5 + $0x8] sm:$0xff] }
  0xe2   :  { %139 = vadd.xlane.f32.xlu0 %v138_v14 }
 0x16b   :  { %v133_v15 = vpop.xlane.xlu0 %132 }
 0x16c   :  { %v134_v16 = vmul.f32 0.0078125, %v133_v15 }
 0x16e   :  { %v142_v18 = vmul.f32 %v134_v16, %v134_v16  ;;  %v145_v26 = vsub.f32 %v124_v7, %v134_v16  ;;  %v146_v27 = vsub.f32 %v126_v8, %v134_v16  ;;  %v1297_v8 = vld [vmem:[%s1606_s5 + $0x28] sm:$0xff]  ;;  %v1299_v16 = vld [vmem:[%s1606_s5 + $0x30] sm:$0xff] }
 0x16f   :  { %v140_v17 = vpop.xlane.xlu0 %139 }
 0x170   :  { %v141_v19 = vmul.f32 0.0078125, %v140_v17 }
 0x172   :  { %v143_v20 = vsub.f32 %v141_v19, %v142_v18  ;;  %v188_v19 = vld [vmem:[%s1606_s5] sm:$0xff] }
 0x174   :  { %v144_v21 = vmax.f32 %v143_v20, 0.0 }
 0x176   :  { %v147_v22 = vadd.f32 1e-05, %v144_v21 }
 0x178   :  { %1340 = vrsqrt.f32 %v147_v22 }
 0x182   :  { %v1341_v28 = vpop.eup %1340 }
 0x183   :  { %v149_v29 = vmul.f32 %v1341_v28, %v145_v26  ;;  %v150_v30 = vmul.f32 %v1341_v28, %v146_v27 }
 0x185   :  { %v157_v34 = vmul.f32 %v155_v25, %v149_v29  ;;  %v158_v35 = vmul.f32 %v155_v25, %v150_v30  ;;  %v1303_v25 = vld [vmem:[%s1606_s5 + $0x40] sm:$0xff] }
 0x187   :  { %v165_v37 = vadd.f32 %v163_v36, %v157_v34  ;;  %v166_v38 = vadd.f32 %v163_v36, %v158_v35 }
 0x189   :  { %v167_v41 = vmax.f32 %v165_v37, 0.0  ;;  %v168_v42 = vmax.f32 %v166_v38, 0.0 }
 0x18b   :  { %v180_v43 = vmul.f32 %v1462_v39, %v167_v41  ;;  %v181_v44 = vmul.f32 %v1464_v40, %v168_v42  ;;  %v999_v42 = vld [vmem:[%s1607_s7] sm:$0xff] }
 0x18d   :  { %187 = vst.msk [vmem:[#allocation2 + $0x10] sm:$0xff] %vm129_vm2, %v181_v44  ;;  %372 = vrot.lane.b32.xlu0 %v180_v43, %s1350_s3  ;;  %v991_v44 = vld [vmem:[%s1609_s6] sm:$0xff] }
 0x194   :  { %v191_v45 = vld [vmem:[#allocation2 + $0x10] sm:$0xff] }
 0x195   :  { %374 = vrot.lane.b32.xlu1 %v191_v45, %s1350_s3  ;;  %628 = vrot.lane.b32.xlu0 %v191_v45, %s1351_s1 }
 0x199   :  { %461 = vrot.lane.b32.xlu1 %v180_v43, %s1352_s15  ;;  %283 = vrot.lane.b32.xlu0 %v1348_v1, %s1353_s16 }
 0x19d   :  { %463 = vrot.lane.b32.xlu1 %v191_v45, %s1352_s15  ;;  %714 = vrot.lane.b32.xlu0 %v191_v45, %s1354_s17 }
 0x1a1   :  { %459 = vrot.lane.b32.xlu1 %v1348_v1, %s1352_s15  ;;  %201 = vrot.lane.b32.xlu0 %v191_v45, %s1355_s18 }
 0x1a5   :  { %626 = vrot.lane.b32.xlu1 %v180_v43, %s1351_s1  ;;  %798 = vrot.lane.b32.xlu0 %v180_v43, %s1356_s19 }
 0x1a9   :  { %197 = vrot.lane.b32.xlu1 %v1348_v1, %s1355_s18  ;;  %285 = vrot.lane.b32.xlu0 %v180_v43, %s1353_s16 }
 0x1ad   :  { %712 = vrot.lane.b32.xlu1 %v180_v43, %s1354_s17  ;;  %886 = vrot.lane.b32.xlu0 %v191_v45, %s1357_s20 }
 0x1b1   :  { %199 = vrot.lane.b32.xlu1 %v180_v43, %s1355_s18 }
 0x1b5   :  { %800 = vrot.lane.b32.xlu1 %v191_v45, %s1356_s19 }
 0x1b9   :  { %287 = vrot.lane.b32.xlu1 %v191_v45, %s1353_s16 }
 0x1bd   :  { %884 = vrot.lane.b32.xlu1 %v180_v43, %s1357_s20 }
 0x1ff   :  { %v373_v47 = vpop.permute.xlu0 %372 }
 0x200   :  { %v377_v51 = vsel %vm376_vm3, %v371_v46, %v373_v47 }
 0x207   :  { %v375_v48 = vpop.permute.xlu1 %374  ;;  %v629_v53 = vpop.permute.xlu0 %628 }
 0x208   :  { %v378_v49 = vsel %vm376_vm3, %v373_v47, %v375_v48 }
 0x209   :  { %384 = vmatprep.subr.mxu1 %v378_v49 }
 0x20a   :  { %385 = vmatpush1.msra.mxu1 %v377_v51 }
 0x20b   :  { %v462_v52 = vpop.permute.xlu1 %461  ;;  %1292 = vmatmul.mubr.msk.f32.vlgmr.msra.gmra.mrb[0].mxu1 %vm208_vm4, %v1291_v50  ;;  %v284_v56 = vpop.permute.xlu0 %283 }
 0x20c   :  { %537 = vmatprep.mubr.f32.mxu1 %v1348_v1 }
 0x20f   :  { %v464_v54 = vpop.permute.xlu1 %463  ;;  %v715_v60 = vpop.permute.xlu0 %714 }
 0x210   :  { %v467_v55 = vsel %vm465_vm5, %v462_v52, %v464_v54 }
 0x211   :  { %473 = vmatprep.subr.mxu1 %v467_v55 }
 0x213   :  { %v460_v57 = vpop.permute.xlu1 %459  ;;  %v202_v3 = vpop.permute.xlu0 %201 }
 0x214   :  { %v466_v59 = vsel %vm465_vm5, %v460_v57, %v462_v52 }
 0x215   :  { %474 = vmatpush1.msra.mxu1 %v466_v59 }
 0x216   :  { %1294 = vmatmul.mubr.msk.f32.vlgmr.msra.gmra.mrb[0].mxu1 %vm208_vm4, %v1293_v58  ;;  %551 = vmatprep.subr.mxu1 %v191_v45 }
 0x217   :  { %v627_v61 = vpop.permute.xlu1 %626  ;;  %552 = vmatpush1.msra.mxu1 %v180_v43  ;;  %615 = vmatprep.mubr.f32.mxu1 %v1348_v1  ;;  %v799_v6 = vpop.permute.xlu0 %798  ;;  %v1140_v43 = vld [vmem:[%s1608_s9] sm:$0xff] }
 0x218   :  { %637 = vmatprep.subr.mxu1 %v629_v53  ;;  %v631_v4 = vsel %vm630_vm6, %v627_v61, %v629_v53 }
 0x21b   :  { %v198_v62 = vpop.permute.xlu1 %197  ;;  %v286_v14 = vpop.permute.xlu0 %285 }
 0x21c   :  { %v290_v18 = vsel %vm289_vm9, %v284_v56, %v286_v14 }
 0x21e   :  { %1296 = vmatmul.mubr.msk.f32.vlgmr.msra.gmra.mrb[0].mxu1 %vm208_vm4, %v1295_v63 }
 0x21f   :  { %638 = vmatpush1.msra.mxu1 %v631_v4  ;;  %v713_v5 = vpop.permute.xlu1 %712  ;;  %701 = vmatprep.mubr.f32.mxu1 %v1348_v1  ;;  %v887_v21 = vpop.permute.xlu0 %886 }
 0x220   :  { %723 = vmatprep.subr.mxu1 %v715_v60  ;;  %v717_v12 = vsel %vm716_vm8, %v713_v5, %v715_v60  ;;  %v1009_v5 = vld [vmem:[%s1610_s8] sm:$0xff] }
 0x223   :  { %v200_v7 = vpop.permute.xlu1 %199 }
 0x224   :  { %v204_v9 = vsel %vm203_vm7, %v198_v62, %v200_v7  ;;  %v205_v10 = vsel %vm203_vm7, %v200_v7, %v202_v3  ;;  %v1176_v7 = vld [vmem:[%s1611_s11] sm:$0xff] }
 0x225   :  { %212 = vmatprep.subr.mxu0 %v205_v10 }
 0x226   :  { %213 = vmatpush1.msra.mxu0 %v204_v9  ;;  %1298 = vmatmul.mubr.msk.f32.vlgmr.msra.gmra.mrb[0].mxu1 %vm208_vm4, %v1297_v8 }
 0x227   :  { %724 = vmatpush1.msra.mxu1 %v717_v12  ;;  %v801_v13 = vpop.permute.xlu1 %800  ;;  %787 = vmatprep.mubr.f32.mxu1 %v1348_v1 }
 0x228   :  { %809 = vmatprep.subr.mxu1 %v801_v13  ;;  %1289 = vmatmul.mubr.msk.f32.vlgmr.msra.gmra.mrb[2].mxu0 %vm208_vm4, %v1288_v11  ;;  %v803_v20 = vsel %vm802_vm10, %v799_v6, %v801_v13  ;;  %v1010_v6 = vld [vmem:[%s1610_s8 + $0x8] sm:$0xff] }
 0x229   :  { %361 = vmatprep.mubr.f32.mxu0 %v1348_v1 }
 0x22b   :  { %v288_v15 = vpop.permute.xlu1 %287 }
 0x22c   :  { %v291_v17 = vsel %vm289_vm9, %v286_v14, %v288_v15 }
 0x22d   :  { %297 = vmatprep.subr.mxu0 %v291_v17 }
 0x22e   :  { %298 = vmatpush1.msra.mxu0 %v290_v18  ;;  %1300 = vmatmul.mubr.msk.f32.vlgmr.msra.gmra.mrb[0].mxu1 %vm208_vm4, %v1299_v16 }
 0x22f   :  { %810 = vmatpush1.msra.mxu1 %v803_v20  ;;  %873 = vmatprep.mubr.f32.mxu1 %v1348_v1  ;;  %v885_v22 = vpop.permute.xlu1 %884 }
 0x230   :  { %895 = vmatprep.subr.mxu1 %v887_v21  ;;  %1290 = vmatmul.mubr.msk.f32.vlgmr.msra.gmra.mrb[2].mxu0 %vm208_vm4, %v188_v19  ;;  %v889_v24 = vsel %vm888_vm11, %v885_v22, %v887_v21 }
 0x231   :  { %1081 = vmatprep.mubr.f32.mxu0 %v1348_v1 }
 0x236   :  { %1302 = vmatmul.mubr.msk.f32.vlgmr.msra.gmra.mrb[0].mxu1 %vm208_vm4, %v1301_v23 }
 0x237   :  { %896 = vmatpush1.msra.mxu1 %v889_v24  ;;  %959 = vmatprep.mubr.f32.mxu1 %v1348_v1 }
 0x23e   :  { %1304 = vmatmul.mubr.msk.f32.vlgmr.msra.gmra.mrb[0].mxu1 %vm208_vm4, %v1303_v25 }
 0x303   :  { %v363_v26 = vpop.f32.mrb[2].mxu0 }
 0x304   :  { %v365_v27 = vpop.f32.mrb[3].mxu0 }
 0x311   :  { %v961_v28 = vpop.f32.mrb[0].mxu1 }
 0x312   :  { %v1311_v29 = vadd.f32 %v961_v28, %v363_v26  ;;  %v963_v30 = vpop.f32.mrb[1].mxu1  ;;  %v1141_v26 = vld [vmem:[%s1608_s9 + $0x8] sm:$0xff] }
 0x313   :  { %v1312_v31 = vadd.f32 %v963_v30, %v365_v27  ;;  %v1178_v27 = vld [vmem:[%s1613_s12] sm:$0xff]  ;;  %v1179_v30 = vld [vmem:[%s1613_s12 + $0x8] sm:$0xff] }
 0x314   :  { %v968_v32 = vmul.f32 %v1311_v29, %v1462_v39 }
 0x315   :  { %v969_v33 = vmul.f32 %v1312_v31, %v1464_v40 }
 0x316   :  { %v975_v37 = vmul.f32 %v1311_v29, %v968_v32 }
 0x317   :  { %v970_v34 = vsel %vm129_vm2, %v969_v33, 0.0  ;;  %v976_v35 = vmul.f32 %v1312_v31, %v969_v33 }
 0x318   :  { %v971_v36 = vadd.f32 %v970_v34, %v968_v32 }
 0x319   :  { %v977_v38 = vsel %vm129_vm2, %v976_v35, 0.0 }
 0x31a   :  { %972 = vadd.xlane.f32.xlu1 %v971_v36  ;;  %v978_v41 = vadd.f32 %v977_v38, %v975_v37 }
 0x31c   :  { %979 = vadd.xlane.f32.xlu0 %v978_v41 }
 0x32b   :  { %1002 = vperm.xlu1 %1337, %v999_v42  }
 0x32f   :  { %1144 = vperm.xlu1 %1337, %v1140_v43  }
 0x332   :  { %994 = vperm.xlu0 %1338, %v991_v44  }
 0x3a7   :  { %v973_v45 = vpop.xlane.xlu1 %972 }
 0x3a8   :  { %v974_v46 = vmul.f32 0.0078125, %v973_v45 }
 0x3a9   :  { %v980_v47 = vpop.xlane.xlu0 %979 }
 0x3aa   :  { %v981_v48 = vmul.f32 0.0078125, %v980_v47  ;;  %v982_v49 = vmul.f32 %v974_v46, %v974_v46  ;;  %v985_v53 = vsub.f32 %v1311_v29, %v974_v46  ;;  %v986_v54 = vsub.f32 %v1312_v31, %v974_v46 }
 0x3ab   :  { %v1003_v61 = vpop.permute.xlu1 %1002 }
 0x3ac   :  { %v983_v50 = vsub.f32 %v981_v48, %v982_v49 }
 0x3ae   :  { %v984_v51 = vmax.f32 %v983_v50, 0.0 }
 0x3af   :  { %v1145_v33 = vpop.permute.xlu1 %1144 }
 0x3b0   :  { %v987_v52 = vadd.f32 1e-05, %v984_v51 }
 0x3b1   :  { %v995_v56 = vpop.permute.xlu0 %994 }
 0x3b2   :  { %1342 = vrsqrt.f32 %v987_v52 }
 0x3bc   :  { %v1343_v55 = vpop.eup %1342 }
 0x3bd   :  { %v989_v57 = vmul.f32 %v1343_v55, %v985_v53  ;;  %v990_v58 = vmul.f32 %v1343_v55, %v986_v54 }
 0x3bf   :  { %v997_v59 = vmul.f32 %v995_v56, %v989_v57  ;;  %v998_v60 = vmul.f32 %v995_v56, %v990_v58 }
 0x3c1   :  { %v1005_v62 = vadd.f32 %v1003_v61, %v997_v59  ;;  %v1006_v63 = vadd.f32 %v1003_v61, %v998_v60 }
 0x3c3   :  { %v1007_v3 = vmax.f32 %v1005_v62, 0.0  ;;  %v1008_v4 = vmax.f32 %v1006_v63, 0.0 }
 0x3c5   :  { %1017 = vmatprep.subr.mxu0 %v1008_v4 }
 0x3c6   :  { %1018 = vmatpush1.msra.mxu0 %v1007_v3 }
 0x3c7   :  { %1305 = vmatmul.mubr.msk.f32.vlgmr.msra.gmra.mrb[4].mxu0 %vm208_vm4, %v1009_v5  ;;  %1307 = vmatprep.subr.msk.mxu0 %vm53_vm0, %v1438_v2  ;;  %v1177_v2 = vld [vmem:[%s1611_s11 + $0x8] sm:$0xff] }
 0x3c8   :  { %1087 = vmatprep.mubr.f32.mxu0 %v1348_v1  ;;  %1308 = vmatpush1.msk.msra.mxu0 %vm53_vm0, %v1431_v0 }
 0x3cb   :  { %1306 = vmatmul.mubr.msk.f32.gmra.mrb[6].mxu0 %vm208_vm4, %v1010_v6 }
 0x3cc   :  { %1260 = vmatprep.mubr.f32.mxu0 %v1348_v1 }
 0x3cf   :  { %1309 = vmatmul.mubr.msk.f32.vlgmr.msra.gmra.mrb[8].mxu0 %vm49_vm1, %v1176_v7 }
 0x3d0   :  { %1266 = vmatprep.mubr.f32.mxu0 %v1348_v1 }
 0x3d3   :  { %1310 = vmatmul.mubr.msk.f32.gmra.mrb[10].mxu0 %vm49_vm1, %v1177_v2 }
 0x49a   :  { %v1083_v8 = vpop.f32.mrb[4].mxu0 }
 0x49b   :  { %v1085_v0 = vpop.f32.mrb[5].mxu0  ;;  %v1094_v9 = vmul.f32 %v1083_v8, %v1462_v39 }
 0x49c   :  { %v1095_v10 = vmul.f32 %v1085_v0, %v1464_v40 }
 0x49d   :  { %v1108_v15 = vmul.f32 %v1094_v9, %v1083_v8 }
 0x49e   :  { %v1109_v11 = vmul.f32 %v1095_v10, %v1085_v0  ;;  %v1556_v12 = vpop.f32.mrb[6].mxu0  ;;  %v1098_v13 = vsel %vm129_vm2, %v1095_v10, 0.0 }
 0x49f   :  { %v1559_v14 = vpop.f32.mrb[7].mxu0  ;;  %v1099_v1 = vadd.f32 %v1098_v13, %v1094_v9  ;;  %v1096_v16 = vmul.f32 %v1556_v12, %v1462_v39  ;;  %v1156_v39 = vld [vmem:[%s1612_s10] sm:$0xff] }
 0x4a0   :  { %v1097_v17 = vmul.f32 %v1559_v14, %v1464_v40  ;;  %v1112_v18 = vsel %vm129_vm2, %v1109_v11, 0.0  ;;  %v1157_v40 = vld [vmem:[%s1612_s10 + $0x8] sm:$0xff] }
 0x4a1   :  { %1100 = vadd.xlane.f32.xlu1 %v1099_v1  ;;  %v1113_v19 = vadd.f32 %v1112_v18, %v1108_v15  ;;  %v1110_v20 = vmul.f32 %v1096_v16, %v1556_v12 }
 0x4a2   :  { %v1111_v21 = vmul.f32 %v1097_v17, %v1559_v14  ;;  %v1102_v22 = vsel %vm129_vm2, %v1097_v17, 0.0  ;;  %v1262_v28 = vpop.f32.mrb[8].mxu0 }
 0x4a3   :  { %v1103_v23 = vadd.f32 %v1102_v22, %v1096_v16  ;;  %v1264_v29 = vpop.f32.mrb[9].mxu0 }
 0x4a4   :  { %v1116_v24 = vsel %vm129_vm2, %v1111_v21, 0.0 }
 0x4a5   :  { %1114 = vadd.xlane.f32.xlu1 %v1113_v19  ;;  %1104 = vadd.xlane.f32.xlu0 %v1103_v23  ;;  %v1117_v25 = vadd.f32 %v1116_v24, %v1110_v20 }
 0x4a6   :  { %v1268_v31 = vpop.f32.mrb[10].mxu0 }
 0x4a7   :  { %v1270_v32 = vpop.f32.mrb[11].mxu0 }
 0x4b6   :  { %1160 = vperm.xlu1 %1337, %v1156_v39  }
 0x4ba   :  { %1165 = vperm.xlu1 %1337, %v1157_v40  }
 0x4bb   :  { %1149 = vperm.xlu0 %1338, %v1141_v26  }
 0x4be   :  { %1182 = vperm.xlu1 %1337, %v1178_v27  }
 0x4e2   :  { %1118 = vadd.xlane.f32.xlu1 %v1117_v25 }
 0x4f3   :  { %1187 = vperm.xlu1 %1337, %v1179_v30  }
 0x52e   :  { %v1101_v34 = vpop.xlane.xlu1 %1100 }
 0x52f   :  { %v1106_v35 = vmul.f32 0.0078125, %v1101_v34 }
 0x531   :  { %v1122_v37 = vmul.f32 %v1106_v35, %v1106_v35  ;;  %v1128_v46 = vsub.f32 %v1083_v8, %v1106_v35  ;;  %v1129_v47 = vsub.f32 %v1085_v0, %v1106_v35 }
 0x532   :  { %v1115_v36 = vpop.xlane.xlu1 %1114  ;;  %v1105_v62 = vpop.xlane.xlu0 %1104 }
 0x533   :  { %v1120_v38 = vmul.f32 0.0078125, %v1115_v36  ;;  %v1107_v63 = vmul.f32 0.0078125, %v1105_v62 }
 0x535   :  { %v1124_v41 = vsub.f32 %v1120_v38, %v1122_v37  ;;  %v1123_v4 = vmul.f32 %v1107_v63, %v1107_v63  ;;  %v1130_v8 = vsub.f32 %v1556_v12, %v1107_v63  ;;  %v1131_v0 = vsub.f32 %v1559_v14, %v1107_v63 }
 0x536   :  { %v1161_v44 = vpop.permute.xlu1 %1160 }
 0x537   :  { %v1126_v42 = vmax.f32 %v1124_v41, 0.0 }
 0x539   :  { %v1132_v43 = vadd.f32 1e-05, %v1126_v42 }
 0x53a   :  { %v1166_v45 = vpop.permute.xlu1 %1165  ;;  %v1150_v13 = vpop.permute.xlu0 %1149 }
 0x53b   :  { %1344 = vrsqrt.f32 %v1132_v43 }
 0x53e   :  { %v1183_v53 = vpop.permute.xlu1 %1182 }
 0x53f   :  { %v1263_v58 = vadd.f32 %v1262_v28, %v1183_v53  ;;  %v1265_v59 = vadd.f32 %v1264_v29, %v1183_v53 }
 0x545   :  { %v1345_v48 = vpop.eup %1344 }
 0x546   :  { %v1136_v49 = vmul.f32 %v1345_v48, %v1128_v46  ;;  %v1137_v50 = vmul.f32 %v1345_v48, %v1129_v47 }
 0x548   :  { %v1152_v51 = vmul.f32 %v1145_v33, %v1136_v49  ;;  %v1153_v52 = vmul.f32 %v1145_v33, %v1137_v50 }
 0x54a   :  { %v1168_v54 = vadd.f32 %v1161_v44, %v1152_v51  ;;  %v1169_v55 = vadd.f32 %v1161_v44, %v1153_v52 }
 0x54c   :  { %v1172_v56 = vmax.f32 %v1168_v54, 0.0  ;;  %v1173_v57 = vmax.f32 %v1169_v55, 0.0 }
 0x54e   :  { %v1273_v60 = vadd.f32 %v1263_v58, %v1172_v56  ;;  %v1274_v61 = vadd.f32 %v1265_v59, %v1173_v57 }
 0x550   :  { %1277 = vst [vmem:[%s1614_s13] sm:$0xff] %v1273_v60  ;;  %1278 = vst.msk [vmem:[%s1614_s13 + $0x8] sm:$0xff] %vm129_vm2, %v1274_v61 }
 0x56f   :  { %v1119_v3 = vpop.xlane.xlu1 %1118 }
 0x570   :  { %v1121_v5 = vmul.f32 0.0078125, %v1119_v3 }
 0x572   :  { %v1125_v6 = vsub.f32 %v1121_v5, %v1123_v4 }
 0x573   :  { %v1188_v16 = vpop.permute.xlu1 %1187 }
 0x574   :  { %v1127_v7 = vmax.f32 %v1125_v6, 0.0  ;;  %v1269_v21 = vadd.f32 %v1268_v31, %v1188_v16  ;;  %v1271_v22 = vadd.f32 %v1270_v32, %v1188_v16 }
 0x576   :  { %v1133_v2 = vadd.f32 1e-05, %v1127_v7 }
 0x578   :  { %1346 = vrsqrt.f32 %v1133_v2 }
 0x582   :  { %v1347_v9 = vpop.eup %1346 }
 0x583   :  { %v1138_v10 = vmul.f32 %v1347_v9, %v1130_v8  ;;  %v1139_v11 = vmul.f32 %v1347_v9, %v1131_v0 }
 0x585   :  { %v1154_v1 = vmul.f32 %v1150_v13, %v1138_v10  ;;  %v1155_v15 = vmul.f32 %v1150_v13, %v1139_v11 }
 0x587   :  { %v1170_v17 = vadd.f32 %v1166_v45, %v1154_v1  ;;  %v1171_v18 = vadd.f32 %v1166_v45, %v1155_v15 }
 0x589   :  { %v1174_v19 = vmax.f32 %v1170_v17, 0.0  ;;  %v1175_v20 = vmax.f32 %v1171_v18, 0.0 }
 0x58b   :  { %v1275_v23 = vadd.f32 %v1269_v21, %v1174_v19  ;;  %v1276_v24 = vadd.f32 %v1271_v22, %v1175_v20 }
 0x58d   :  { %1279 = vst [vmem:[%s1614_s13 + $0x10] sm:$0xff] %v1275_v23  ;;  %1280 = vst.msk [vmem:[%s1614_s13 + $0x18] sm:$0xff] %vm129_vm2, %v1276_v24 }

</bundles_post_ra>
